<compile_context>
chip_gen: v5e
topology: v5e:2x2
jax: 0.10.0
libtpu: 0.0.40
codegen_flags: <defaults>
</compile_context>

<pallas_src>
import jax
import jax.numpy as jnp
from jax.experimental import pallas as pl
from jax.experimental.pallas import tpu as pltpu


def _round_up(x, m):
    return (x + m - 1) // m * m


def _cdiv(a, b):
    return (a + b - 1) // b


def _make_mean_pool_kernel(scrub_seq_tail):
    """scrub_seq_tail is a compile-time flag: True iff S % TS != 0, i.e. the last sequence
    tile of the (un-padded) hidden state reads past S. Those positions hold undefined data
    (could even be NaN), so they must be removed with a select — multiplying by the
    zero-padded mask alone is not enough (NaN * 0 == NaN)."""

    def kernel(h_ref, m_ref, o_ref, acc_ref, cnt_ref):
        # h_ref: (TB, TS, H)   m_ref: (TB, TS)   o_ref: (TB, H)
        # acc_ref: (TB, H) f32, cnt_ref: (TB, 1) f32 — resident across the seq (reduction) axis.
        k = pl.program_id(1)

        @pl.when(k == 0)
        def _():
            acc_ref[...] = jnp.zeros_like(acc_ref)
            cnt_ref[...] = jnp.zeros_like(cnt_ref)

        h = h_ref[...]                                    # native dtype (f32 / bf16)
        m = m_ref[...]                                    # 0/1 mask, zero-padded past S
        prod = h * m.astype(h.dtype)[:, :, None]          # exact for a 0/1 mask
        if scrub_seq_tail:
            # Ragged sequence tail: mask is 0 there (host-side zero pad of the small mask),
            # the select guarantees the undefined hidden values contribute exactly 0.
            prod = jnp.where((m != 0)[:, :, None], prod, 0.0)
        # f32 accumulation without keeping a separate pre-cast copy of the whole tile alive.
        acc_ref[...] += jnp.sum(prod, axis=1, dtype=jnp.float32)
        cnt_ref[...] += jnp.sum(m.astype(jnp.float32), axis=1, keepdims=True)

        @pl.when(k == pl.num_programs(1) - 1)
        def _():
            inv = 1.0 / jnp.maximum(cnt_ref[...], 1e-9)   # torch.clamp(min=1e-9)
            o_ref[...] = (acc_ref[...] * inv).astype(o_ref.dtype)

    return kernel


def mean_pooling(last_hidden_state, attention_mask, *, block_elem_budget=None):
    B, S, H = last_hidden_state.shape
    isz = jnp.dtype(last_hidden_state.dtype).itemsize
    msz = jnp.dtype(attention_mask.dtype).itemsize

    # ---- per-generation VMEM plan -------------------------------------------------------
    # Physical VMEM per TensorCore; fall back to the smallest modern value (v7x: 64 MiB).
    phys = 64 << 20
    try:
        cap = getattr(pltpu.get_tpu_info(), "vmem_capacity_bytes", None)
        if cap:
            phys = int(cap)
    except Exception:
        pass
    # ~48 MiB usable on v7x (64 MiB physical / TC), ~96 MiB on v5e / v6e (128 MiB physical).
    usable = max(min(phys - (16 << 20), (phys * 3) // 4), 12 << 20)
    # Per-step hidden-block element budget; (3*isz + 4) covers the double-buffered input
    # block plus the in-kernel product / f32 reduction temporaries.
    if block_elem_budget is None:
        elem_budget = max((usable - (2 << 20)) // (3 * isz + 4), 8 * 128)
    else:
        elem_budget = int(block_elem_budget)              # test / tuning override

    # ---- tile sizing --------------------------------------------------------------------
    TB = B if B < 8 else 8                                # sublane-dense mask / output tiles
    ts_cap = max(elem_budget // (TB * H), 1)
    if ts_cap >= S or S <= 128:
        TS = S                                            # whole sequence per step
        if B > 8 and ts_cap >= S:
            # Fill leftover budget with more batch rows (fewer, fatter grid steps)...
            tb_cap = max((elem_budget // (S * H)) // 8 * 8, 8)
            Bp8 = _round_up(B, 8)
            TB = min(tb_cap, Bp8)
            # ...but keep >=2 steps on the parallel batch axis so both v7x TensorCores get
            # work (costs only one extra ~0.35us step on single-core v5e/v6e).
            if TB >= Bp8:
                TB = max(8, _round_up(_cdiv(Bp8, 2), 8))
        # TODO(synk): for B <= 8 on v7x the parallel batch axis has a single step and one
        # TensorCore idles; a parallel H-tiling grid axis would recover that 2x.
    else:
        # When tiling the sequence, TS must be a multiple of 128 so the (TB, TS) mask block
        # satisfies the (8, 128) lane-tiling constraint and DMAs stay lane-dense.
        TS = max((ts_cap // 128) * 128, 128)
        # TODO(synk): for extremely large H (TB*128*H*isz above the VMEM budget) tile H on a
        # third parallel grid axis instead of over-subscribing VMEM.

    nb = _cdiv(B, TB)
    ns = _cdiv(S, TS)
    Bp = nb * TB
    Sp = ns * TS
    scrub_seq_tail = (S % TS) != 0

    # Only the small (B, S) mask is zero-padded host-side (padded tokens/rows count as 0).
    # The large hidden-state tensor is NOT padded: ragged tail blocks are read as partial
    # blocks and neutralized in-kernel, avoiding a full extra HBM copy of (B, S, H).
    m = attention_mask
    if (Bp, Sp) != (B, S):
        m = jnp.pad(m, ((0, Bp - B), (0, Sp - S)))

    est_vmem = (TB * TS * H) * (3 * isz + 4) + 2 * TB * TS * msz + 4 * TB * H * 4 + (1 << 20)
    vmem_limit = int(min(max(usable, est_vmem), max(phys - (8 << 20), 16 << 20)))

    out = pl.pallas_call(
        _make_mean_pool_kernel(scrub_seq_tail),
        out_shape=jax.ShapeDtypeStruct((Bp, H), jnp.float32),
        grid_spec=pltpu.PrefetchScalarGridSpec(
            num_scalar_prefetch=0,
            grid=(nb, ns),                                 # batch parallel, seq = reduction (last)
            in_specs=[
                pl.BlockSpec((TB, TS, H), lambda i, k: (i, k, 0)),
                pl.BlockSpec((TB, TS), lambda i, k: (i, k)),
            ],
            out_specs=pl.BlockSpec((TB, H), lambda i, k: (i, 0)),   # resident across seq axis
            scratch_shapes=[
                pltpu.VMEM((TB, H), jnp.float32),          # sum accumulator
                pltpu.VMEM((TB, 1), jnp.float32),          # token-count accumulator
            ],
        ),
        compiler_params=pltpu.CompilerParams(
            dimension_semantics=("parallel", "arbitrary"),
            vmem_limit_bytes=vmem_limit,
        ),
        cost_estimate=pl.CostEstimate(
            flops=2 * B * S * H,
            transcendentals=0,
            bytes_accessed=B * S * H * isz + Bp * Sp * msz + Bp * H * 4,
        ),
    )(last_hidden_state, m)

    return out[:B] if Bp != B else out


def mean_pooling_ref(last_hidden_state, attention_mask):
    m = attention_mask[..., None].astype(jnp.float32)
    sum_emb = jnp.sum(last_hidden_state.astype(jnp.float32) * m, axis=1)
    sum_mask = jnp.clip(jnp.sum(m, axis=1), 1e-9, None)
    return sum_emb / sum_mask


if __name__ == "__main__":
    key = jax.random.PRNGKey(0)
    k1, k2, k3, k4 = jax.random.split(key, 4)

    # ---- primary small-shape check (whole sequence per step) ----
    B, S, H = 2, 8, 32
    last_hidden_state = jax.random.normal(k1, (B, S, H), dtype=jnp.float32)
    attention_mask = (jax.random.uniform(k2, (B, S)) > 0.3).astype(jnp.int32)  # 0/1 like HF

    out = mean_pooling(last_hidden_state, attention_mask)
    out = jax.block_until_ready(out)
    ref = mean_pooling_ref(last_hidden_state, attention_mask)
    assert out.shape == (B, H)
    assert jnp.allclose(out, ref, atol=1e-5, rtol=1e-5)

    # ---- ragged-sequence check: forces TS=128 tiles over S=320 (un-padded hidden state,
    #      in-kernel tail scrub + zero-padded mask) ----
    B2, S2, H2 = 3, 320, 32
    h2 = jax.random.normal(k3, (B2, S2, H2), dtype=jnp.float32)
    m2 = (jax.random.uniform(k4, (B2, S2)) > 0.3).astype(jnp.int32)
    out2 = jax.block_until_ready(mean_pooling(h2, m2, block_elem_budget=B2 * H2 * 200))
    ref2 = mean_pooling_ref(h2, m2)
    assert out2.shape == (B2, H2)
    assert jnp.allclose(out2, ref2, atol=1e-5, rtol=1e-5)

    print("KERNEL_OK")
</pallas_src>

<mosaic_0001>
module attributes {stable_mosaic.version = 11 : i64} {
  func.func @kernel(%arg0: i32, %arg1: i32, %arg2: memref<2x8x32xf32, #tpu.memory_space<vmem>>, %arg3: memref<2x8xi32, #tpu.memory_space<vmem>>, %arg4: memref<2x32xf32, #tpu.memory_space<vmem>>, %arg5: memref<2x32xf32, #tpu.memory_space<vmem>>, %arg6: memref<2x1xf32, #tpu.memory_space<vmem>>) attributes {dimension_semantics = [#tpu.dimension_semantics<parallel>, #tpu.dimension_semantics<arbitrary>], iteration_bounds = array<i64: 1, 1>, scalar_prefetch = 0 : i64, scratch_operands = 2 : i64, tpu.core_type = #tpu.core_type<tc>, window_params = [{transform_indices = @transform_0, window_bounds = array<i64: 2, 8, 32>}, {transform_indices = @transform_1, window_bounds = array<i64: 2, 8>}, {transform_indices = @transform_2, window_bounds = array<i64: 2, 32>}]} {
    %c0_i32 = arith.constant 0 : i32
    %0 = arith.cmpi eq, %arg1, %c0_i32 : i32
    %1 = arith.extui %0 : i1 to i32
    %c0_i32_0 = arith.constant 0 : i32
    %2 = arith.cmpi ne, %1, %c0_i32_0 : i32
    scf.if %2 {
      %cst_16 = arith.constant 0.000000e+00 : f32
      %22 = vector.broadcast %cst_16 : f32 to vector<2x32xf32>
      %c0_17 = arith.constant 0 : index
      %c0_18 = arith.constant 0 : index
      %23 = vector.load %arg5[%c0_17, %c0_18] : memref<2x32xf32, #tpu.memory_space<vmem>>, vector<2x32xf32>
      tpu.vector_store %arg5[%c0_17, %c0_18], %22 {strides = array<i32>} : memref<2x32xf32, #tpu.memory_space<vmem>>, vector<2x32xf32>,
      %cst_19 = arith.constant 0.000000e+00 : f32
      %24 = vector.broadcast %cst_19 : f32 to vector<2x1xf32>
      %c0_20 = arith.constant 0 : index
      %c0_21 = arith.constant 0 : index
      %25 = vector.load %arg6[%c0_20, %c0_21] : memref<2x1xf32, #tpu.memory_space<vmem>>, vector<2x1xf32>
      tpu.vector_store %arg6[%c0_20, %c0_21], %24 {strides = array<i32>} : memref<2x1xf32, #tpu.memory_space<vmem>>, vector<2x1xf32>,
    } else {
    }
    %c0 = arith.constant 0 : index
    %c0_1 = arith.constant 0 : index
    %c0_2 = arith.constant 0 : index
    %3 = vector.load %arg2[%c0, %c0_1, %c0_2] : memref<2x8x32xf32, #tpu.memory_space<vmem>>, vector<2x8x32xf32>
    %c0_3 = arith.constant 0 : index
    %c0_4 = arith.constant 0 : index
    %4 = vector.load %arg3[%c0_3, %c0_4] : memref<2x8xi32, #tpu.memory_space<vmem>>, vector<2x8xi32>
    %5 = arith.sitofp %4 : vector<2x8xi32> to vector<2x8xf32>
    %6 = vector.shape_cast %5 : vector<2x8xf32> to vector<2x8x1xf32>
    %7 = vector.broadcast %6 : vector<2x8x1xf32> to vector<2x8x32xf32>
    %8 = arith.mulf %3, %7 : vector<2x8x32xf32>
    %c0_5 = arith.constant 0 : index
    %c0_6 = arith.constant 0 : index
    %9 = vector.load %arg5[%c0_5, %c0_6] : memref<2x32xf32, #tpu.memory_space<vmem>>, vector<2x32xf32>
    %cst = arith.constant dense<0.000000e+00> : vector<2x32xf32>
    %10 = vector.multi_reduction <add>, %8, %cst [1] : vector<2x8x32xf32> to vector<2x32xf32>
    %11 = arith.addf %9, %10 : vector<2x32xf32>
    %c0_7 = arith.constant 0 : index
    %c0_8 = arith.constant 0 : index
    %12 = vector.load %arg5[%c0_7, %c0_8] : memref<2x32xf32, #tpu.memory_space<vmem>>, vector<2x32xf32>
    tpu.vector_store %arg5[%c0_7, %c0_8], %11 {strides = array<i32>} : memref<2x32xf32, #tpu.memory_space<vmem>>, vector<2x32xf32>,
    %c0_9 = arith.constant 0 : index
    %c0_10 = arith.constant 0 : index
    %13 = vector.load %arg6[%c0_9, %c0_10] : memref<2x1xf32, #tpu.memory_space<vmem>>, vector<2x1xf32>
    %14 = arith.sitofp %4 : vector<2x8xi32> to vector<2x8xf32>
    %cst_11 = arith.constant dense<0.000000e+00> : vector<2xf32>
    %15 = vector.multi_reduction <add>, %14, %cst_11 [1] : vector<2x8xf32> to vector<2xf32>
    %16 = vector.shape_cast %15 : vector<2xf32> to vector<2x1xf32>
    %17 = arith.addf %13, %16 : vector<2x1xf32>
    %c0_12 = arith.constant 0 : index
    %c0_13 = arith.constant 0 : index
    %18 = vector.load %arg6[%c0_12, %c0_13] : memref<2x1xf32, #tpu.memory_space<vmem>>, vector<2x1xf32>
    tpu.vector_store %arg6[%c0_12, %c0_13], %17 {strides = array<i32>} : memref<2x1xf32, #tpu.memory_space<vmem>>, vector<2x1xf32>,
    %c0_i32_14 = arith.constant 0 : i32
    %19 = arith.cmpi eq, %arg1, %c0_i32_14 : i32
    %20 = arith.extui %19 : i1 to i32
    %c0_i32_15 = arith.constant 0 : i32
    %21 = arith.cmpi ne, %20, %c0_i32_15 : i32
    scf.if %21 {
      %c0_16 = arith.constant 0 : index
      %c0_17 = arith.constant 0 : index
      %22 = vector.load %arg6[%c0_16, %c0_17] : memref<2x1xf32, #tpu.memory_space<vmem>>, vector<2x1xf32>
      %cst_18 = arith.constant 9.99999971E-10 : f32
      %23 = vector.broadcast %cst_18 : f32 to vector<2x1xf32>
      %24 = arith.maximumf %22, %23 : vector<2x1xf32>
      %cst_19 = arith.constant 1.000000e+00 : f32
      %25 = vector.broadcast %cst_19 : f32 to vector<2x1xf32>
      %26 = arith.divf %25, %24 : vector<2x1xf32>
      %c0_20 = arith.constant 0 : index
      %c0_21 = arith.constant 0 : index
      %27 = vector.load %arg5[%c0_20, %c0_21] : memref<2x32xf32, #tpu.memory_space<vmem>>, vector<2x32xf32>
      %28 = vector.broadcast %26 : vector<2x1xf32> to vector<2x32xf32>
      %29 = arith.mulf %27, %28 : vector<2x32xf32>
      %c0_22 = arith.constant 0 : index
      %c0_23 = arith.constant 0 : index
      %30 = vector.load %arg4[%c0_22, %c0_23] : memref<2x32xf32, #tpu.memory_space<vmem>>, vector<2x32xf32>
      tpu.vector_store %arg4[%c0_22, %c0_23], %29 {strides = array<i32>} : memref<2x32xf32, #tpu.memory_space<vmem>>, vector<2x32xf32>,
    } else {
    }
    return
  }
  func.func @transform_0(%arg0: i32, %arg1: i32) -> (i32, i32, i32) {
    %c0_i32 = arith.constant 0 : i32
    %c0_i32_0 = arith.constant 0 : i32
    return %arg0, %arg1, %c0_i32 : i32, i32, i32
  }
  func.func @transform_1(%arg0: i32, %arg1: i32) -> (i32, i32) {
    %c0_i32 = arith.constant 0 : i32
    return %arg0, %arg1 : i32, i32
  }
  func.func @transform_2(%arg0: i32, %arg1: i32) -> (i32, i32) {
    %c0_i32 = arith.constant 0 : i32
    %c0_i32_0 = arith.constant 0 : i32
    return %arg0, %c0_i32 : i32, i32
  }
}

</mosaic_0001>

<bundles_post_ra>
// kernel: tpu_custom_call.1
= control target key start
LH: loop header
LB: loop body
LE: loop exit
PB: predicated region body
PF: predicated region fallthrough
CT: control target
= control target key end

     0   :  { %7 = vsyncpa [#allocation5], 0  ;;  %s275_s0 = inlined_call_operand.hbm [shape: f32[2,8,32], index: 0, kind: input, shape index: {}]   ;;  %s276_s1 = inlined_call_operand.hbm [shape: s32[2,8], index: 1, kind: input, shape index: {}]   ;;  %s277_s2 = inlined_call_operand.hbm [shape: f32[2,32], index: 2, kind: output, shape index: {}]  }
   0x1   :  { %8 = vsyncpa [#allocation8], 0 }
   0x2   :  { %9 = vsyncpa [#allocation6], 0  ;;  %s14_s11 = sshll.u32 %s275_s0, 4  ;;  %s239_s12 = smov [#allocation4]   ;;  %s15_s11 = int_to_ptr.hbm [resolvable:$true] %s14_s11 }
   0x3   :  { %s16_s13 = sshll.u32 %s239_s12, 4  ;;  %s28_s16 = sshll.u32 %s276_s1, 4  ;;  %s17_s13 = int_to_ptr.vmem [resolvable:$true] %s16_s13  ;;  %s29_s16 = int_to_ptr.hbm [resolvable:$true] %s28_s16 }
   0x4   :  { %s240_s17 = smov 128   ;;  %s241_s18 = smov 8  }
   0x5   :  { %22 = dma.hbm_to_vmem [thread:$0]  %s15_s11, 256, %s17_s13, [#allocation5], %s240_s17, %s240_s17, %s241_s18  }
   0x6   :  { %s242_s19 = smov [#allocation7]  }
   0x7   :  { %s30_s20 = sshll.u32 %s242_s19, 4  ;;  %s31_s20 = int_to_ptr.vmem [resolvable:$true] %s30_s20 }
   0x8   :  { %33 = dma.hbm_to_vmem [thread:$0]  %s29_s16, 32, %s31_s20, [#allocation8]  }
   0x9   :  { %233 = dma.done.wait [#allocation5], 256  }
   0xa   :  { %234 = vsyncadd [#allocation5], 4294967040 }
   0xb   :  { %235 = dma.done.wait [#allocation8], 32  }
   0xc   :  { %236 = vsyncadd [#allocation8], 4294967264  ;;  %v55_v0 = vlaneseq  ;;  %vm48_vm0 = vcmask 1024   ;;  %v243_v1 = vmov 0.0   ;;  %v52_v3 = vld [vmem:[#allocation7] sm:$0x3] }
   0xd   :  { %49 = vst.msk [vmem:[#allocation3] sm:$0x3] %vm48_vm0, %v243_v1  ;;  %vm95_vm1 = vcmask 58368   ;;  %v53_v4 = vcvt.s32.f32 %v52_v3  ;;  %v244_v8 = vmov 0   ;;  %vm46_vm2 = vcmask 254976   ;;  %v51_v25 = vld [vmem:[#allocation4 + $0x8] sm:$0xff] }
   0xe   :  { %v56_v2 = vshrl.u32 %v55_v0, 7  ;;  %47 = vst.msk [vmem:[#allocation2] sm:$0x3] %vm46_vm2, %v243_v1  ;;  %v50_v27 = vld [vmem:[#allocation4] sm:$0xff]  ;;  %vm71_vm7 = vcmask 261120   ;;  %vm88_vm8 = vcmask 1041409  }
   0xf   :  { %v96_v5 = vsel %vm95_vm1, %v53_v4, 0.0  ;;  %v61_v6 = vperm.slane %v53_v4, 1  ;;  %v54_v7 = vperm.slane %v53_v4, 0  ;;  %s245_s0 = smov [#allocation9]   ;;  %s137_s23 = sshll.u32 %s277_s2, 4  ;;  %s138_s23 = int_to_ptr.hbm [resolvable:$true] %s137_s23 }
  0x10   :  { %156 = vset.pattern.permute.xlu1 %v56_v2  ;;  %155 = vset.pattern.permute.xlu0 %v56_v2  ;;  %s135_s1 = sshll.u32 %s245_s0, 4  ;;  %s136_s1 = int_to_ptr.vmem [resolvable:$true] %s135_s1 }
  0x11   :  { %97 = vadd.xlane.f32.xlu0 %v96_v5 }
  0x14   :  { %v94_v9 = vld [vmem:[#allocation3] sm:$0x3] }
  0x15   :  { %v70_v45 = vld [vmem:[#allocation2] sm:$0x3] }
  0x18   :  { %66 = vperm.xlu1 %156, %v61_v6  }
  0x20   :  { %157 = vset.pattern.permute.xlu1 %v244_v8 }
  0x25   :  { %59 = vperm.xlu0 %155, %v54_v7  }
  0x2d   :  { %158 = vset.pattern.permute.xlu0 %v244_v8 }
  0x84   :  { %v98_v10 = vpop.xlane.xlu0 %97 }
  0x85   :  { %v99_v11 = vadd.f32 %v98_v10, %v94_v9 }
  0x87   :  { %101 = vst.msk [vmem:[#allocation3] sm:$0x3] %vm48_vm0, %v99_v11 }
  0x8a   :  { %v67_v24 = vpop.permute.xlu1 %66 }
  0x8b   :  { %v69_v28 = vmul.f32 %v67_v24, %v51_v25 }
  0x8d   :  { %v79_v30 = vsel %vm71_vm7, %v69_v28, 0.0 }
  0x8e   :  { %v105_v12 = vld [vmem:[#allocation3] sm:$0x3]  ;;  %v80_v32 = vrot.slane %v79_v30, 4 }
  0x8f   :  { %v106_v13 = vmax.f32 %v105_v12, 1e-09 }
  0x90   :  { %v81_v34 = vadd.f32 %v80_v32, %v79_v30 }
  0x91   :  { %159 = vrcp.f32 %v106_v13  ;;  %v118_v17 = vand.u32 2147483648, %v106_v13  ;;  %v116_v19 = vand.u32 2147483647, %v106_v13  ;;  %vm112_vm4 = vweird.f32 %v106_v13 }
  0x92   :  { %v82_v36 = vrot.slane %v81_v34, 2 }
  0x93   :  { %v119_v21 = vor.u32 1.1754944e-38, %v118_v17  ;;  %vm117_vm6 = vcmp.eq.f32.partialorder %v116_v19, 8.507059e+37 }
  0x94   :  { %v83_v38 = vadd.f32 %v82_v36, %v81_v34 }
  0x96   :  { %v84_v40 = vrot.slane %v83_v38, 1 }
  0x97   :  { %v160_v14 = vpop.eup %159  ;;  %v60_v26 = vpop.permute.xlu0 %59 }
  0x98   :  { %v108_v15 = vmul.f32 %v160_v14, %v106_v13  ;;  %vm113_vm3 = vweird.f32 %v160_v14  ;;  %v68_v29 = vmul.f32 %v60_v26, %v50_v27  ;;  %v85_v42 = vadd.f32 %v84_v40, %v83_v38 }
  0x99   :  { %vm114_vm5 = vmor %vm112_vm4, %vm113_vm3 }
  0x9a   :  { %v109_v16 = vsub.f32 1.0, %v108_v15  ;;  %v72_v31 = vsel %vm71_vm7, %v68_v29, 0.0 }
  0x9b   :  { %v73_v33 = vrot.slane %v72_v31, 4 }
  0x9c   :  { %v110_v18 = vmul.f32 %v160_v14, %v109_v16 }
  0x9d   :  { %v74_v35 = vadd.f32 %v73_v33, %v72_v31 }
  0x9e   :  { %v111_v20 = vadd.f32 %v160_v14, %v110_v18 }
  0x9f   :  { %v75_v37 = vrot.slane %v74_v35, 2 }
  0xa0   :  { %v115_v22 = vsel %vm114_vm5, %v160_v14, %v111_v20 }
  0xa1   :  { %v120_v23 = vsel %vm117_vm6, %v119_v21, %v115_v22  ;;  %v76_v39 = vadd.f32 %v75_v37, %v74_v35 }
  0xa2   :  { %125 = vperm.xlu1 %157, %v120_v23  }
  0xa3   :  { %v77_v41 = vrot.slane %v76_v39, 1 }
  0xa5   :  { %v78_v43 = vadd.f32 %v77_v41, %v76_v39 }
  0xa7   :  { %v89_v44 = vsel %vm88_vm8, %v85_v42, %v78_v43 }
  0xa8   :  { %v91_v46 = vadd.f32 %v89_v44, %v70_v45 }
  0xaa   :  { %93 = vst.msk [vmem:[#allocation2] sm:$0x3] %vm46_vm2, %v91_v46 }
  0xb1   :  { %v122_v48 = vld [vmem:[#allocation2] sm:$0x3] }
 0x114   :  { %v126_v47 = vpop.permute.xlu1 %125 }
 0x115   :  { %v128_v49 = vmul.f32 %v126_v47, %v122_v48 }
 0x117   :  { %129 = vst.msk [vmem:[#allocation9] sm:$0x3] %vm46_vm2, %v128_v49 }
 0x118   :  { %140 = dma.vmem_to_hbm [thread:$0]  %s136_s1, 32, %s138_s23, [#allocation6]  }
 0x119   :  { %237 = dma.done.wait [#allocation6], 32  }
 0x11a   :  { %238 = vsyncadd [#allocation6], 4294967264 }
 0x11b   :  { %145 = vsyncpa [#allocation5], 1 }
 0x11c   :  { %146 = vsyncpa [#allocation8], 1 }
 0x11d   :  { %147 = vsyncpa [#allocation6], 1 }

</bundles_post_ra>
